<compile_context>
chip_gen: v7x
topology: tpu7x:2x2x1
jax: 0.10.0
libtpu: 0.0.40
codegen_flags: <defaults>
</compile_context>

<pallas_src>
import functools

import jax
import jax.numpy as jnp
from jax.experimental import pallas as pl
from jax.experimental.pallas import tpu as pltpu

LANES = 128
SUBLANES = 8


def _round_up(x, m):
    return ((x + m - 1) // m) * m


def _num_tensorcores():
    """2 on v7x-class chips (2 TC/chip), 1 on v5e/v6e; safe fallback 1."""
    try:
        kind = jax.devices()[0].device_kind.lower()
    except Exception:
        return 1
    return 2 if ("v7" in kind or "7x" in kind) else 1


def _depth_l1_kernel(pred_ref, gt_ref, sum_ref, cnt_ref, *,
                     eps, rows, tile_rows, blocks_per_split, total_blocks,
                     can_overrun, has_partial_tail):
    c = pl.program_id(0)   # TensorCore split (size 1 on v5e/v6e)
    j = pl.program_id(1)   # reduction steps within the split

    @pl.when(j == 0)
    def _():
        sum_ref[...] = jnp.zeros_like(sum_ref)
        cnt_ref[...] = jnp.zeros_like(cnt_ref)

    b = c * blocks_per_split + j          # logical block index
    groups = tile_rows // SUBLANES

    def accumulate(apply_row_mask):
        pred = pred_ref[...]
        gt = gt_ref[...]
        # Compare / sub / abs / select in the input dtype (bf16-native VPU on
        # v6e/v7x); cast to f32 only at the fold/accumulate.
        mask = gt > jnp.asarray(eps, dtype=gt.dtype)
        if apply_row_mask:
            # Boundary block only: rows past `rows` hold undefined VMEM data.
            # Keep the select semantics (NOT mask * diff) so garbage NaN/Inf
            # never reaches the sum.
            row0 = b * tile_rows
            local = jax.lax.broadcasted_iota(jnp.int32, (tile_rows, LANES), 0)
            mask = jnp.logical_and(mask, (row0 + local) < rows)
        diff = jnp.where(mask, jnp.abs(pred - gt),
                         jnp.zeros((), dtype=pred.dtype)).astype(jnp.float32)
        cnt = mask.astype(jnp.float32)
        # Fold (tile_rows, 128) -> (8, 128) with pure vreg adds; accumulate
        # into the VMEM-resident output blocks (shape (1, 8, 128)).
        sum_ref[...] += jnp.sum(
            diff.reshape(groups, SUBLANES, LANES), axis=0)[None]
        cnt_ref[...] += jnp.sum(
            cnt.reshape(groups, SUBLANES, LANES), axis=0)[None]

    last = total_blocks - 1
    if has_partial_tail:
        # Hot path: fully in-range blocks skip the iota/validity mask work.
        @pl.when(b < last)
        def _():
            accumulate(apply_row_mask=False)

        # Boundary block: needs the row-validity mask.
        @pl.when(b == last)
        def _():
            accumulate(apply_row_mask=True)
        # b > last (clamped duplicate block): no accumulation at all.
    elif can_overrun:
        # No partial tail, but a clamped duplicate block can occur (odd block
        # count across 2 splits): skip it entirely.
        @pl.when(b < total_blocks)
        def _():
            accumulate(apply_row_mask=False)
    else:
        # Every step is a full, in-range block: unconditional hot path.
        accumulate(apply_row_mask=False)


def depth_l1_loss(pred, gt, eps=1e-5, tile_rows=None, num_splits=None):
    """Pallas implementation of DepthL1Loss.forward. Returns a scalar f32."""
    bs = pred.shape[0]
    pred_flat = pred.reshape(-1)
    gt_flat = gt.reshape(-1)
    n = pred_flat.shape[0]

    # Minimal fallback pad (< 128 elements) only when numel % 128 != 0.
    # Padded gt == 0 <= eps, so those elements are masked out naturally.
    if n % LANES:
        pad = LANES - (n % LANES)
        pred_flat = jnp.pad(pred_flat, (0, pad))
        gt_flat = jnp.pad(gt_flat, (0, pad))
    rows = pred_flat.shape[0] // LANES

    if num_splits is None:
        num_splits = _num_tensorcores()

    # Row tile: 4096 default (fits v5e 16 MiB scoped VMEM double-buffered),
    # 8192 on v7x; multiple of 8, capped near the real row count so tiny
    # inputs don't waste VMEM.
    if tile_rows is None:
        tile_rows = 8192 if num_splits == 2 else 4096
    tile_rows = max(SUBLANES, min(int(tile_rows), _round_up(rows, SUBLANES)))
    tile_rows = _round_up(tile_rows, SUBLANES)

    pred2d = pred_flat.reshape(rows, LANES)
    gt2d = gt_flat.reshape(rows, LANES)

    total_blocks = pl.cdiv(rows, tile_rows)
    blocks_per_split = pl.cdiv(total_blocks, num_splits)
    can_overrun = num_splits * blocks_per_split > total_blocks
    has_partial_tail = (rows % tile_rows) != 0

    def in_map(c, j):
        # Clamp so the DMA never targets a fully out-of-range block; the
        # kernel statically/dynamically skips such steps.
        return (jnp.minimum(c * blocks_per_split + j, total_blocks - 1), 0)

    kernel = functools.partial(
        _depth_l1_kernel,
        eps=float(eps),
        rows=rows,
        tile_rows=tile_rows,
        blocks_per_split=blocks_per_split,
        total_blocks=total_blocks,
        can_overrun=can_overrun,
        has_partial_tail=has_partial_tail,
    )

    if num_splits == 2:
        # Bind the leading axis to the two TensorCores on v7x.
        split_sem = getattr(pltpu, "CORE_PARALLEL", "parallel")
    else:
        split_sem = "arbitrary"

    out_sum, out_cnt = pl.pallas_call(
        kernel,
        out_shape=(
            jax.ShapeDtypeStruct((num_splits, SUBLANES, LANES), jnp.float32),
            jax.ShapeDtypeStruct((num_splits, SUBLANES, LANES), jnp.float32),
        ),
        grid_spec=pltpu.PrefetchScalarGridSpec(
            num_scalar_prefetch=0,
            grid=(num_splits, blocks_per_split),
            in_specs=[
                pl.BlockSpec((tile_rows, LANES), in_map),
                pl.BlockSpec((tile_rows, LANES), in_map),
            ],
            out_specs=[
                pl.BlockSpec((1, SUBLANES, LANES), lambda c, j: (c, 0, 0)),
                pl.BlockSpec((1, SUBLANES, LANES), lambda c, j: (c, 0, 0)),
            ],
        ),
        compiler_params=pltpu.CompilerParams(
            dimension_semantics=(split_sem, "arbitrary"),
        ),
    )(pred2d, gt2d)

    # Tiny epilogue: combine per-core vector partials, divide, scale by bs.
    total_sum = jnp.sum(out_sum)
    total_cnt = jnp.sum(out_cnt)
    return total_sum / total_cnt * jnp.float32(bs)


def _reference(pred, gt, eps=1e-5):
    bs = pred.shape[0]
    mask = gt > eps
    diff = jnp.where(mask, jnp.abs(pred - gt), 0.0)
    return jnp.sum(diff) / jnp.sum(mask.astype(jnp.float32)) * bs


if __name__ == "__main__":
    key = jax.random.PRNGKey(0)
    k1, k2, k3 = jax.random.split(key, 3)

    B, C, H, W = 2, 4, 16, 16  # NCHW depth maps
    pred = jax.random.uniform(k1, (B, C, H, W), dtype=jnp.float32,
                              minval=0.0, maxval=10.0)
    gt = jax.random.uniform(k2, (B, C, H, W), dtype=jnp.float32,
                            minval=0.0, maxval=10.0)
    # Zero out some gt entries so the eps mask is exercised.
    drop = jax.random.bernoulli(k3, 0.2, (B, C, H, W))
    gt = jnp.where(drop, 0.0, gt)

    loss = depth_l1_loss(pred, gt, eps=1e-5)
    jax.block_until_ready(loss)

    ref = _reference(pred, gt, eps=1e-5)
    assert jnp.allclose(loss, ref, rtol=1e-5, atol=1e-5), (loss, ref)

    print("KERNEL_OK")
</pallas_src>

<mosaic_0001>
module attributes {stable_mosaic.version = 11 : i64} {
  func.func @_depth_l1_kernel(%arg0: i32, %arg1: i32, %arg2: memref<16x128xf32, #tpu.memory_space<vmem>>, %arg3: memref<16x128xf32, #tpu.memory_space<vmem>>, %arg4: memref<1x8x128xf32, #tpu.memory_space<vmem>>, %arg5: memref<1x8x128xf32, #tpu.memory_space<vmem>>) attributes {dimension_semantics = [#tpu.dimension_semantics<arbitrary>, #tpu.dimension_semantics<arbitrary>], iteration_bounds = array<i64: 1, 1>, scalar_prefetch = 0 : i64, scratch_operands = 0 : i64, tpu.core_type = #tpu.core_type<tc>, window_params = [{transform_indices = @transform_0, window_bounds = array<i64: 16, 128>}, {transform_indices = @transform_1, window_bounds = array<i64: 16, 128>}, {transform_indices = @transform_2, window_bounds = array<i64: 1, 8, 128>}, {transform_indices = @transform_3, window_bounds = array<i64: 1, 8, 128>}]} {
    %c0_i32 = arith.constant 0 : i32
    %0 = arith.cmpi eq, %arg1, %c0_i32 : i32
    %1 = arith.extui %0 : i1 to i32
    %c0_i32_0 = arith.constant 0 : i32
    %2 = arith.cmpi ne, %1, %c0_i32_0 : i32
    scf.if %2 {
      %cst_19 = arith.constant 0.000000e+00 : f32
      %25 = vector.broadcast %cst_19 : f32 to vector<1x8x128xf32>
      %c0_20 = arith.constant 0 : index
      %c0_21 = arith.constant 0 : index
      %c0_22 = arith.constant 0 : index
      %26 = vector.load %arg4[%c0_20, %c0_21, %c0_22] : memref<1x8x128xf32, #tpu.memory_space<vmem>>, vector<1x8x128xf32>
      tpu.vector_store %arg4[%c0_20, %c0_21, %c0_22], %25 {strides = array<i32>} : memref<1x8x128xf32, #tpu.memory_space<vmem>>, vector<1x8x128xf32>,
      %cst_23 = arith.constant 0.000000e+00 : f32
      %27 = vector.broadcast %cst_23 : f32 to vector<1x8x128xf32>
      %c0_24 = arith.constant 0 : index
      %c0_25 = arith.constant 0 : index
      %c0_26 = arith.constant 0 : index
      %28 = vector.load %arg5[%c0_24, %c0_25, %c0_26] : memref<1x8x128xf32, #tpu.memory_space<vmem>>, vector<1x8x128xf32>
      tpu.vector_store %arg5[%c0_24, %c0_25, %c0_26], %27 {strides = array<i32>} : memref<1x8x128xf32, #tpu.memory_space<vmem>>, vector<1x8x128xf32>,
    } else {
    }
    %c0 = arith.constant 0 : index
    %c0_1 = arith.constant 0 : index
    %3 = vector.load %arg2[%c0, %c0_1] : memref<16x128xf32, #tpu.memory_space<vmem>>, vector<16x128xf32>
    %c0_2 = arith.constant 0 : index
    %c0_3 = arith.constant 0 : index
    %4 = vector.load %arg3[%c0_2, %c0_3] : memref<16x128xf32, #tpu.memory_space<vmem>>, vector<16x128xf32>
    %cst = arith.constant 9.99999974E-6 : f32
    %5 = vector.broadcast %cst : f32 to vector<16x128xf32>
    %6 = arith.cmpf ogt, %4, %5 : vector<16x128xf32>
    %7 = arith.subf %3, %4 : vector<16x128xf32>
    %8 = math.absf %7 : vector<16x128xf32>
    %cst_4 = arith.constant 0.000000e+00 : f32
    %9 = vector.broadcast %cst_4 : f32 to vector<16x128xf32>
    %10 = arith.select %6, %8, %9 : vector<16x128xi1>, vector<16x128xf32>
    %11 = arith.extui %6 : vector<16x128xi1> to vector<16x128xi32>
    %12 = arith.sitofp %11 : vector<16x128xi32> to vector<16x128xf32>
    %c0_5 = arith.constant 0 : index
    %c0_6 = arith.constant 0 : index
    %c0_7 = arith.constant 0 : index
    %13 = vector.load %arg4[%c0_5, %c0_6, %c0_7] : memref<1x8x128xf32, #tpu.memory_space<vmem>>, vector<1x8x128xf32>
    %14 = vector.shape_cast %10 : vector<16x128xf32> to vector<2x8x128xf32>
    %cst_8 = arith.constant dense<0.000000e+00> : vector<8x128xf32>
    %15 = vector.multi_reduction <add>, %14, %cst_8 [0] : vector<2x8x128xf32> to vector<8x128xf32>
    %16 = vector.shape_cast %15 : vector<8x128xf32> to vector<1x8x128xf32>
    %17 = arith.addf %13, %16 : vector<1x8x128xf32>
    %c0_9 = arith.constant 0 : index
    %c0_10 = arith.constant 0 : index
    %c0_11 = arith.constant 0 : index
    %18 = vector.load %arg4[%c0_9, %c0_10, %c0_11] : memref<1x8x128xf32, #tpu.memory_space<vmem>>, vector<1x8x128xf32>
    tpu.vector_store %arg4[%c0_9, %c0_10, %c0_11], %17 {strides = array<i32>} : memref<1x8x128xf32, #tpu.memory_space<vmem>>, vector<1x8x128xf32>,
    %c0_12 = arith.constant 0 : index
    %c0_13 = arith.constant 0 : index
    %c0_14 = arith.constant 0 : index
    %19 = vector.load %arg5[%c0_12, %c0_13, %c0_14] : memref<1x8x128xf32, #tpu.memory_space<vmem>>, vector<1x8x128xf32>
    %20 = vector.shape_cast %12 : vector<16x128xf32> to vector<2x8x128xf32>
    %cst_15 = arith.constant dense<0.000000e+00> : vector<8x128xf32>
    %21 = vector.multi_reduction <add>, %20, %cst_15 [0] : vector<2x8x128xf32> to vector<8x128xf32>
    %22 = vector.shape_cast %21 : vector<8x128xf32> to vector<1x8x128xf32>
    %23 = arith.addf %19, %22 : vector<1x8x128xf32>
    %c0_16 = arith.constant 0 : index
    %c0_17 = arith.constant 0 : index
    %c0_18 = arith.constant 0 : index
    %24 = vector.load %arg5[%c0_16, %c0_17, %c0_18] : memref<1x8x128xf32, #tpu.memory_space<vmem>>, vector<1x8x128xf32>
    tpu.vector_store %arg5[%c0_16, %c0_17, %c0_18], %23 {strides = array<i32>} : memref<1x8x128xf32, #tpu.memory_space<vmem>>, vector<1x8x128xf32>,
    return
  }
  func.func @transform_0(%arg0: i32, %arg1: i32) -> (i32, i32) {
    %c1_i32 = arith.constant 1 : i32
    %0 = arith.muli %arg0, %c1_i32 : i32
    %1 = arith.addi %0, %arg1 : i32
    %c0_i32 = arith.constant 0 : i32
    %2 = arith.minsi %1, %c0_i32 : i32
    %c0_i32_0 = arith.constant 0 : i32
    %c0_i32_1 = arith.constant 0 : i32
    return %2, %c0_i32_0 : i32, i32
  }
  func.func @transform_1(%arg0: i32, %arg1: i32) -> (i32, i32) {
    %c1_i32 = arith.constant 1 : i32
    %0 = arith.muli %arg0, %c1_i32 : i32
    %1 = arith.addi %0, %arg1 : i32
    %c0_i32 = arith.constant 0 : i32
    %2 = arith.minsi %1, %c0_i32 : i32
    %c0_i32_0 = arith.constant 0 : i32
    %c0_i32_1 = arith.constant 0 : i32
    return %2, %c0_i32_0 : i32, i32
  }
  func.func @transform_2(%arg0: i32, %arg1: i32) -> (i32, i32, i32) {
    %c0_i32 = arith.constant 0 : i32
    %c0_i32_0 = arith.constant 0 : i32
    %c0_i32_1 = arith.constant 0 : i32
    return %arg0, %c0_i32, %c0_i32_0 : i32, i32, i32
  }
  func.func @transform_3(%arg0: i32, %arg1: i32) -> (i32, i32, i32) {
    %c0_i32 = arith.constant 0 : i32
    %c0_i32_0 = arith.constant 0 : i32
    %c0_i32_1 = arith.constant 0 : i32
    return %arg0, %c0_i32, %c0_i32_0 : i32, i32, i32
  }
}

</mosaic_0001>

<bundles_post_ra>
// kernel: tpu_custom_call.1
= control target key start
LH: loop header
LB: loop body
LE: loop exit
PB: predicated region body
PF: predicated region fallthrough
CT: control target
= control target key end

     0   :  { %9 = vsyncpa [#allocation3], 0  ;;  %s307_s0 = inlined_call_operand.hbm [shape: f32[16,128], index: 0, kind: input, shape index: {}]   ;;  %s308_s1 = inlined_call_operand.hbm [shape: f32[16,128], index: 1, kind: input, shape index: {}]   ;;  %s309_s2 = inlined_call_operand.hbm [shape: f32[1,8,128], index: 2, kind: output, shape index: {0}]   ;;  %s310_s3 = inlined_call_operand.hbm [shape: f32[1,8,128], index: 3, kind: output, shape index: {1}]  }
   0x1   :  { %10 = vsyncpa [#allocation6], 0 }
   0x2   :  { %11 = vsyncpa [#allocation4], 0 }
   0x3   :  { %12 = vsyncpa [#allocation9], 0  ;;  %s232_s12 = smov [#allocation2]   ;;  %s136_s16 = scalar_lea.hbm %s307_s0, 256 }
   0x4   :  { %s24_s13 = sshll.u32 %s232_s12, 4  ;;  %p137_p0 = scmp.ne.s32.totalorder %s307_s0, %s136_s16  ;;  %s25_s13 = int_to_ptr.vmem [resolvable:$true] %s24_s13 }
   0x5   :  { %p140_p1 = scmp.lt.u32.totalorder %s136_s16, %s307_s0 }
   0x7   :  { %p142_p2 = pnand %p140_p1, %p137_p0 }
   0x9   :  { %145 = shalt.err (!%p142_p2)
}
   0xa   :  { %s146_s21 = scalar_lea.vmem %s25_s13, 256  ;;  %p151_p4 = scmp.lt.s32.totalorder %s25_s13, %s25_s13 }
   0xb   :  { %p147_p3 = scmp.ne.s32.totalorder %s25_s13, %s146_s21  ;;  %p152_p5 = scmp.lt.s32.totalorder %s146_s21, %s146_s21 }
   0xd   :  { %p153_p6 = por %p152_p5, %p151_p4 }
   0xf   :  { %p154_p7 = pnand %p153_p6, %p147_p3 }
  0x11   :  { %157 = shalt.err (!%p154_p7)
}
  0x12   :  { %s233_s22 = smov 128   ;;  %s234_s23 = smov 8  }
  0x13   :  { %30 = dma.hbm_to_vmem [thread:$0]  %s307_s0, 256, %s25_s13, [#allocation3], %s233_s22, %s233_s22, %s234_s23  }
  0x14   :  { %s235_s26 = smov [#allocation5]   ;;  %s158_s30 = scalar_lea.hbm %s308_s1, 256 }
  0x15   :  { %s42_s27 = sshll.u32 %s235_s26, 4  ;;  %p159_p8 = scmp.ne.s32.totalorder %s308_s1, %s158_s30  ;;  %s43_s27 = int_to_ptr.vmem [resolvable:$true] %s42_s27 }
  0x16   :  { %p162_p9 = scmp.lt.u32.totalorder %s158_s30, %s308_s1 }
  0x18   :  { %p164_p10 = pnand %p162_p9, %p159_p8 }
  0x1a   :  { %167 = shalt.err (!%p164_p10)
}
  0x1b   :  { %s168_s8 = scalar_lea.vmem %s43_s27, 256  ;;  %p173_p12 = scmp.lt.s32.totalorder %s43_s27, %s43_s27 }
  0x1c   :  { %p169_p11 = scmp.ne.s32.totalorder %s43_s27, %s168_s8  ;;  %p174_p13 = scmp.lt.s32.totalorder %s168_s8, %s168_s8 }
  0x1e   :  { %p175_p0 = por %p174_p13, %p173_p12 }
  0x20   :  { %p176_p1 = pnand %p175_p0, %p169_p11 }
  0x22   :  { %179 = shalt.err (!%p176_p1)
}
  0x23   :  { %48 = dma.hbm_to_vmem [thread:$0]  %s308_s1, 256, %s43_s27, [#allocation6], %s233_s22, %s233_s22, %s234_s23  }
  0x24   :  { %224 = dma.done.wait [#allocation3], 256  }
  0x25   :  { %225 = vsyncadd [#allocation3], 4294967040 }
  0x26   :  { %226 = dma.done.wait [#allocation6], 256  }
  0x27   :  { %227 = vsyncadd [#allocation6], 4294967040  ;;  %v69_v0 = vld [vmem:[#allocation2] sm:$0xff]  ;;  %v70_v1 = vld [vmem:[#allocation2 + $0x8] sm:$0xff]  ;;  %v236_v6 = vmov 0.0   ;;  %s237_s10 = smov [#allocation8]  }
  0x28   :  { %v71_v2 = vld [vmem:[#allocation5] sm:$0xff]  ;;  %v72_v3 = vld [vmem:[#allocation5 + $0x8] sm:$0xff]  ;;  %s109_s11 = sshll.u32 %s237_s10, 4  ;;  %s238_s1 = smov [#allocation7]   ;;  %s110_s11 = int_to_ptr.vmem [resolvable:$true] %s109_s11 }
  0x29   :  { %vm73_vm0 = vcmp.gt.f32.partialorder %v71_v2, 1e-05  ;;  %v75_v4 = vsub.f32 %v69_v0, %v71_v2  ;;  %vm74_vm1 = vcmp.gt.f32.partialorder %v72_v3, 1e-05  ;;  %v76_v5 = vsub.f32 %v70_v1, %v72_v3  ;;  %s99_s12 = sshll.u32 %s238_s1, 4  ;;  %s180_s13 = scalar_lea.vmem %s110_s11, 128  ;;  %s100_s12 = int_to_ptr.vmem [resolvable:$true] %s99_s12 }
  0x2a   :  { %v127_v7 = vsel %vm73_vm0, 1.0, %v236_v6  ;;  %v128_v9 = vsel %vm74_vm1, 1.0, %v236_v6  ;;  %p181_p2 = scmp.ne.s32.totalorder %s110_s11, %s180_s13  ;;  %p185_p3 = scmp.lt.s32.totalorder %s110_s11, %s110_s11 }
  0x2b   :  { %v77_v8 = vand.u32 2147483647, %v75_v4  ;;  %v78_v10 = vand.u32 2147483647, %v76_v5  ;;  %v90_v11 = vadd.f32 %v128_v9, %v127_v7  ;;  %p186_p4 = scmp.lt.s32.totalorder %s180_s13, %s180_s13 }
  0x2d   :  { %v79_v12 = vsel %vm73_vm0, %v77_v8, 0.0  ;;  %v80_v13 = vsel %vm74_vm1, %v78_v10, 0.0  ;;  %92 = vst [vmem:[#allocation8] sm:$0xff] %v90_v11  ;;  %p187_p5 = por %p186_p4, %p185_p3 }
  0x2e   :  { %v86_v14 = vadd.f32 %v80_v13, %v79_v12 }
  0x2f   :  { %p188_p6 = pnand %p187_p5, %p181_p2 }
  0x31   :  { %191 = shalt.err (!%p188_p6)
}
  0x32   :  { %s192_s16 = scalar_lea.hbm %s310_s3, 128 }
  0x33   :  { %p193_p7 = scmp.ne.s32.totalorder %s310_s3, %s192_s16  ;;  %p196_p8 = scmp.lt.u32.totalorder %s192_s16, %s310_s3 }
  0x35   :  { %p198_p9 = pnand %p196_p8, %p193_p7 }
  0x37   :  { %201 = shalt.err (!%p198_p9)
}
  0x38   :  { %112 = dma.vmem_to_hbm [thread:$0]  %s110_s11, 128, %s310_s3, [#allocation9]   ;;  %88 = vst [vmem:[#allocation7] sm:$0xff] %v86_v14 }
  0x39   :  { %s202_s23 = scalar_lea.vmem %s100_s12, 128  ;;  %p207_p11 = scmp.lt.s32.totalorder %s100_s12, %s100_s12 }
  0x3a   :  { %p203_p10 = scmp.ne.s32.totalorder %s100_s12, %s202_s23  ;;  %p208_p12 = scmp.lt.s32.totalorder %s202_s23, %s202_s23 }
  0x3c   :  { %p209_p13 = por %p208_p12, %p207_p11 }
  0x3e   :  { %p210_p0 = pnand %p209_p13, %p203_p10 }
  0x40   :  { %213 = shalt.err (!%p210_p0)
}
  0x41   :  { %s214_s26 = scalar_lea.hbm %s309_s2, 128 }
  0x42   :  { %p215_p1 = scmp.ne.s32.totalorder %s309_s2, %s214_s26  ;;  %p218_p2 = scmp.lt.u32.totalorder %s214_s26, %s309_s2 }
  0x44   :  { %p220_p3 = pnand %p218_p2, %p215_p1 }
  0x46   :  { %223 = shalt.err (!%p220_p3)
}
  0x47   :  { %102 = dma.vmem_to_hbm [thread:$0]  %s100_s12, 128, %s309_s2, [#allocation4]  }
  0x48   :  { %228 = dma.done.wait [#allocation4], 128  }
  0x49   :  { %229 = vsyncadd [#allocation4], 4294967168 }
  0x4a   :  { %230 = dma.done.wait [#allocation9], 128  }
  0x4b   :  { %231 = vsyncadd [#allocation9], 4294967168 }
  0x4c   :  { %119 = vsyncpa [#allocation3], 1 }
  0x4d   :  { %120 = vsyncpa [#allocation6], 1 }
  0x4e   :  { %121 = vsyncpa [#allocation4], 1 }
  0x4f   :  { %122 = vsyncpa [#allocation9], 1 }

</bundles_post_ra>
